<compile_context>
chip_gen: v7x
topology: tpu7x:2x2x1
jax: 0.10.0
libtpu: 0.0.40
codegen_flags: <defaults>
</compile_context>

<pallas_src>
import jax
import jax.numpy as jnp
from jax.experimental import pallas as pl
from jax.experimental.pallas import tpu as pltpu

EPS = 1e-3
LANE = 128
SUBLANE = 8
TARGET_BLOCK_BYTES = 2 * 1024 * 1024   # ~2 MiB of input per buffer per step
MAX_TILE_ROWS = 8192                   # hard cap: keep 4 bufs + acc well under VMEM
NUM_CORES = 2                          # leading "parallel" axis (v7x megacore split)


def _round_up(n, m):
    return ((n + m - 1) // m) * m


def charbonnier_loss(x, y, eps=EPS):
    """Charbonnier loss, matching torch.mean(torch.sqrt(diff*diff + eps*eps))."""
    assert x.shape == y.shape
    n_elem = x.size
    eps2 = float(eps) * float(eps)

    xf = x.reshape(-1)
    yf = y.reshape(-1)

    lane_full = (n_elem // LANE) * LANE
    rows = lane_full // LANE

    # Lane remainder (< 128 elems, only when n_elem % 128 != 0): summed in
    # plain JAX to avoid padded copies of the full inputs.
    if lane_full < n_elem:
        xt = xf[lane_full:].astype(jnp.float32)
        yt = yf[lane_full:].astype(jnp.float32)
        dt = xt - yt
        tail_sum = jnp.sum(jnp.sqrt(dt * dt + jnp.float32(eps2)))
    else:
        tail_sum = jnp.float32(0.0)

    if rows == 0:
        # Fewer than 128 elements total: everything handled above.
        return tail_sum / jnp.float32(n_elem)

    if lane_full < n_elem:
        x2d = xf[:lane_full].reshape(rows, LANE)
        y2d = yf[:lane_full].reshape(rows, LANE)
    else:
        x2d = xf.reshape(rows, LANE)   # free: contiguous flatten/reshape
        y2d = yf.reshape(rows, LANE)

    # Bytes-based tile sizing (keeps DMA per step ~constant across dtypes).
    itemsize = max(x.dtype.itemsize, y.dtype.itemsize)
    rows_for_target = (TARGET_BLOCK_BYTES // (LANE * itemsize)) // SUBLANE * SUBLANE
    max_tile_rows = min(MAX_TILE_ROWS, max(SUBLANE, rows_for_target))
    tile_rows = min(max_tile_rows, _round_up(rows, SUBLANE))   # multiple of 8

    total_tiles = pl.cdiv(rows, tile_rows)
    tiles_per_core = pl.cdiv(total_tiles, NUM_CORES)
    # Mask needed if the 2-core x tiles_per_core x tile_rows grid over-covers rows.
    needs_mask = (NUM_CORES * tiles_per_core * tile_rows) != rows

    if NUM_CORES * tiles_per_core == total_tiles:
        def in_idx(c, t):
            return (c * tiles_per_core + t, 0)
    else:
        # Clamp so the (fully masked) overhang tiles never issue an OOB DMA;
        # their contribution is zeroed in-kernel.
        def in_idx(c, t):
            return (jnp.minimum(c * tiles_per_core + t, total_tiles - 1), 0)

    def kernel(x_ref, y_ref, o_ref, acc_ref):
        t = pl.program_id(1)

        @pl.when(t == 0)
        def _init():
            acc_ref[...] = jnp.zeros_like(acc_ref)

        xv = x_ref[...].astype(jnp.float32)
        yv = y_ref[...].astype(jnp.float32)
        diff = xv - yv
        val = jnp.sqrt(diff * diff + eps2)

        if needs_mask:
            # Zero rows beyond the true row count (unspecified padded data is
            # masked AFTER compute, so NaNs cannot leak into the sum).
            gt = pl.program_id(0) * tiles_per_core + t
            row_ids = gt * tile_rows + jax.lax.broadcasted_iota(
                jnp.int32, val.shape, 0)
            val = jnp.where(row_ids < rows, val, 0.0)

        # Fold block into a single-vreg (8,128) accumulator: layout-preserving
        # reshape (trailing (8,128) == vreg tile) + pure VALU adds.
        acc_ref[...] += val.reshape(tile_rows // SUBLANE, SUBLANE, LANE).sum(axis=0)

        @pl.when(t == pl.num_programs(1) - 1)
        def _finalize():
            o_ref[...] = acc_ref[...]   # per-core partial; reduced in the wrapper

    partials = pl.pallas_call(
        kernel,
        out_shape=jax.ShapeDtypeStruct((NUM_CORES, SUBLANE, LANE), jnp.float32),
        grid_spec=pltpu.PrefetchScalarGridSpec(
            num_scalar_prefetch=0,
            grid=(NUM_CORES, tiles_per_core),
            in_specs=[
                pl.BlockSpec((tile_rows, LANE), in_idx),
                pl.BlockSpec((tile_rows, LANE), in_idx),
            ],
            out_specs=pl.BlockSpec((None, SUBLANE, LANE), lambda c, t: (c, 0, 0)),
            scratch_shapes=[pltpu.VMEM((SUBLANE, LANE), jnp.float32)],
        ),
        compiler_params=pltpu.CompilerParams(
            dimension_semantics=("parallel", "arbitrary"),
            vmem_limit_bytes=32 * 1024 * 1024,   # explicit: v5e default is 16 MiB
        ),
    )(x2d, y2d)

    total = jnp.sum(partials) + tail_sum
    return total / jnp.float32(n_elem)


if __name__ == "__main__":
    key = jax.random.PRNGKey(0)
    kx, ky = jax.random.split(key)

    # NCHW, small shapes consistent with the module.
    x = jax.random.normal(kx, (2, 4, 16, 16), dtype=jnp.float32)
    y = jax.random.normal(ky, (2, 4, 16, 16), dtype=jnp.float32)

    loss = charbonnier_loss(x, y)
    jax.block_until_ready(loss)

    diff = x - y
    ref = jnp.mean(jnp.sqrt(diff * diff + EPS * EPS))
    assert jnp.allclose(loss, ref, atol=1e-5, rtol=1e-5), (loss, ref)

    # Second check: non-aligned element count exercises the mask + lane tail.
    x2 = jax.random.normal(kx, (3, 3, 7, 5), dtype=jnp.float32)
    y2 = jax.random.normal(ky, (3, 3, 7, 5), dtype=jnp.float32)
    loss2 = charbonnier_loss(x2, y2)
    jax.block_until_ready(loss2)
    d2 = x2 - y2
    ref2 = jnp.mean(jnp.sqrt(d2 * d2 + EPS * EPS))
    assert jnp.allclose(loss2, ref2, atol=1e-5, rtol=1e-5), (loss2, ref2)

    print("KERNEL_OK")
</pallas_src>

<mosaic_0001>
module attributes {stable_mosaic.version = 11 : i64} {
  func.func @kernel(%arg0: i32, %arg1: i32, %arg2: memref<16x128xf32, #tpu.memory_space<vmem>>, %arg3: memref<16x128xf32, #tpu.memory_space<vmem>>, %arg4: memref<1x8x128xf32, #tpu.memory_space<vmem>>, %arg5: memref<8x128xf32, #tpu.memory_space<vmem>>) attributes {dimension_semantics = [#tpu.dimension_semantics<parallel>, #tpu.dimension_semantics<arbitrary>], iteration_bounds = array<i64: 2, 1>, scalar_prefetch = 0 : i64, scratch_operands = 1 : i64, tpu.core_type = #tpu.core_type<tc>, window_params = [{transform_indices = @transform_0, window_bounds = array<i64: 16, 128>}, {transform_indices = @transform_1, window_bounds = array<i64: 16, 128>}, {transform_indices = @transform_2, window_bounds = array<i64: 1, 8, 128>}]} {
    %c0_i32 = arith.constant 0 : i32
    %0 = arith.cmpi eq, %arg1, %c0_i32 : i32
    %1 = arith.extui %0 : i1 to i32
    %c0_i32_0 = arith.constant 0 : i32
    %2 = arith.cmpi ne, %1, %c0_i32_0 : i32
    scf.if %2 {
      %cst_13 = arith.constant 0.000000e+00 : f32
      %28 = vector.broadcast %cst_13 : f32 to vector<8x128xf32>
      %c0_14 = arith.constant 0 : index
      %c0_15 = arith.constant 0 : index
      %29 = vector.load %arg5[%c0_14, %c0_15] : memref<8x128xf32, #tpu.memory_space<vmem>>, vector<8x128xf32>
      tpu.vector_store %arg5[%c0_14, %c0_15], %28 {strides = array<i32>} : memref<8x128xf32, #tpu.memory_space<vmem>>, vector<8x128xf32>,
    } else {
    }
    %c0 = arith.constant 0 : index
    %c0_1 = arith.constant 0 : index
    %3 = vector.load %arg2[%c0, %c0_1] : memref<16x128xf32, #tpu.memory_space<vmem>>, vector<16x128xf32>
    %c0_2 = arith.constant 0 : index
    %c0_3 = arith.constant 0 : index
    %4 = vector.load %arg3[%c0_2, %c0_3] : memref<16x128xf32, #tpu.memory_space<vmem>>, vector<16x128xf32>
    %5 = arith.subf %3, %4 : vector<16x128xf32>
    %6 = arith.mulf %5, %5 : vector<16x128xf32>
    %cst = arith.constant 9.99999997E-7 : f32
    %7 = vector.broadcast %cst : f32 to vector<16x128xf32>
    %8 = arith.addf %6, %7 : vector<16x128xf32>
    %9 = math.sqrt %8 : vector<16x128xf32>
    %c1_i32 = arith.constant 1 : i32
    %10 = arith.muli %arg0, %c1_i32 : i32
    %11 = arith.addi %10, %arg1 : i32
    %c16_i32 = arith.constant 16 : i32
    %12 = arith.muli %11, %c16_i32 : i32
    %13 = tpu.iota {dimensions = array<i32: 0>} : vector<16x128xi32>
    %14 = vector.broadcast %12 : i32 to vector<16x128xi32>
    %15 = arith.addi %14, %13 : vector<16x128xi32>
    %c16_i32_4 = arith.constant 16 : i32
    %16 = vector.broadcast %c16_i32_4 : i32 to vector<16x128xi32>
    %17 = arith.cmpi slt, %15, %16 : vector<16x128xi32>
    %cst_5 = arith.constant 0.000000e+00 : f32
    %18 = vector.broadcast %cst_5 : f32 to vector<16x128xf32>
    %19 = arith.select %17, %9, %18 : vector<16x128xi1>, vector<16x128xf32>
    %c0_6 = arith.constant 0 : index
    %c0_7 = arith.constant 0 : index
    %20 = vector.load %arg5[%c0_6, %c0_7] : memref<8x128xf32, #tpu.memory_space<vmem>>, vector<8x128xf32>
    %21 = vector.shape_cast %19 : vector<16x128xf32> to vector<2x8x128xf32>
    %cst_8 = arith.constant dense<0.000000e+00> : vector<8x128xf32>
    %22 = vector.multi_reduction <add>, %21, %cst_8 [0] : vector<2x8x128xf32> to vector<8x128xf32>
    %23 = arith.addf %20, %22 : vector<8x128xf32>
    %c0_9 = arith.constant 0 : index
    %c0_10 = arith.constant 0 : index
    %24 = vector.load %arg5[%c0_9, %c0_10] : memref<8x128xf32, #tpu.memory_space<vmem>>, vector<8x128xf32>
    tpu.vector_store %arg5[%c0_9, %c0_10], %23 {strides = array<i32>} : memref<8x128xf32, #tpu.memory_space<vmem>>, vector<8x128xf32>,
    %c0_i32_11 = arith.constant 0 : i32
    %25 = arith.cmpi eq, %arg1, %c0_i32_11 : i32
    %26 = arith.extui %25 : i1 to i32
    %c0_i32_12 = arith.constant 0 : i32
    %27 = arith.cmpi ne, %26, %c0_i32_12 : i32
    scf.if %27 {
      %c0_13 = arith.constant 0 : index
      %c0_14 = arith.constant 0 : index
      %28 = vector.load %arg5[%c0_13, %c0_14] : memref<8x128xf32, #tpu.memory_space<vmem>>, vector<8x128xf32>
      %c0_15 = arith.constant 0 : index
      %c0_16 = arith.constant 0 : index
      %c0_17 = arith.constant 0 : index
      %29 = vector.load %arg4[%c0_15, %c0_16, %c0_17] : memref<1x8x128xf32, #tpu.memory_space<vmem>>, vector<1x8x128xf32>
      %30 = vector.shape_cast %29 : vector<1x8x128xf32> to vector<8x128xf32>
      %31 = vector.shape_cast %28 : vector<8x128xf32> to vector<1x8x128xf32>
      tpu.vector_store %arg4[%c0_15, %c0_16, %c0_17], %31 {strides = array<i32>} : memref<1x8x128xf32, #tpu.memory_space<vmem>>, vector<1x8x128xf32>,
    } else {
    }
    return
  }
  func.func @transform_0(%arg0: i32, %arg1: i32) -> (i32, i32) {
    %c1_i32 = arith.constant 1 : i32
    %0 = arith.muli %arg0, %c1_i32 : i32
    %1 = arith.addi %0, %arg1 : i32
    %c0_i32 = arith.constant 0 : i32
    %2 = arith.minsi %1, %c0_i32 : i32
    %c0_i32_0 = arith.constant 0 : i32
    %c0_i32_1 = arith.constant 0 : i32
    return %2, %c0_i32_0 : i32, i32
  }
  func.func @transform_1(%arg0: i32, %arg1: i32) -> (i32, i32) {
    %c1_i32 = arith.constant 1 : i32
    %0 = arith.muli %arg0, %c1_i32 : i32
    %1 = arith.addi %0, %arg1 : i32
    %c0_i32 = arith.constant 0 : i32
    %2 = arith.minsi %1, %c0_i32 : i32
    %c0_i32_0 = arith.constant 0 : i32
    %c0_i32_1 = arith.constant 0 : i32
    return %2, %c0_i32_0 : i32, i32
  }
  func.func @transform_2(%arg0: i32, %arg1: i32) -> (i32, i32, i32) {
    %c0_i32 = arith.constant 0 : i32
    %c0_i32_0 = arith.constant 0 : i32
    %c0_i32_1 = arith.constant 0 : i32
    return %arg0, %c0_i32, %c0_i32_0 : i32, i32, i32
  }
}

</mosaic_0001>

<bundles_post_ra>
// kernel: tpu_custom_call.1
= control target key start
LH: loop header
LB: loop body
LE: loop exit
PB: predicated region body
PF: predicated region fallthrough
CT: control target
= control target key end

     0   :  { %7 = vsyncpa [#allocation4], 0  ;;  %s920_s0 = inlined_call_operand.hbm [shape: f32[16,128], index: 0, kind: input, shape index: {}]   ;;  %s921_s1 = inlined_call_operand.hbm [shape: f32[16,128], index: 1, kind: input, shape index: {}]   ;;  %s922_s2 = inlined_call_operand.hbm [shape: f32[2,8,128], index: 2, kind: output, shape index: {}]  }
   0x1   :  { %9 = vsyncpa [#allocation4 + $0x1], 0 }
   0x2   :  { %10 = vsyncpa [#allocation7], 0 }
   0x3   :  { %12 = vsyncpa [#allocation7 + $0x1], 0 }
   0x4   :  { %13 = vsyncpa [#allocation5], 0 }
   0x5   :  { %15 = vsyncpa [#allocation5 + $0x1], 0  ;;  %s712_s9 = smov 0   ;;  %s714_s10 = smov 0  }
   0x6   :  { %s716_s11 = smov 0   ;;  %s718_s12 = smov 0  }
   0x7   :  { %s720_s13 = smov 0   ;;  %s722_s14 = smov 0  }
   0x8   :  { %s724_s15 = smov 0   ;;  %s726_s16 = smov 0  }
   0x9 LB: > { %s405_s17 = sadd.s32 4294967295, %s690_s16   ;;  %s406_s18 = sadd.s32 4294967294, %s690_s16   ;;  %s690_s16 = sphi %s726_s16, %s21_s16   ;;  %s686_s15 = sphi %s724_s15, %s941_s15   ;;  %s682_s14 = sphi %s722_s14, %s940_s14   ;;  %s678_s13 = sphi %s720_s13, %s910_s13   ;;  %s674_s12 = sphi %s718_s12, %s939_s12   ;;  %s670_s11 = sphi %s716_s11, %s938_s11   ;;  %s666_s10 = sphi %s714_s10, %s937_s10   ;;  %s662_s9 = sphi %s712_s9, %s936_s9  }
   0xa   : > { %s33_s19 = sadd.s32 1, %s686_s15  ;;  %p659_p1 = scmp.ne.s32.totalorder %s678_s13, 0 }
   0xb   : > { %p35_p0 = scmp.ge.s32.totalorder %s33_s19, 2  ;;  %p54_p2 = scmp.eq.s32.totalorder %s690_s16, 0 }
   0xc   : > { %p59_p3 = scmp.ne.s32.totalorder %s678_s13, %s674_s12  ;;  %p60_p5 = scmp.eq.s32.totalorder %s405_s17, 0 }
   0xd   : > { %s943_s19 = smov (%p35_p0, %s33_s19), 0  ;;  %p758_p4 = por %p659_p1, %p54_p2 }
   0xe   : > { %p762_p6 = por %p60_p5, %p59_p3  ;;  %s101_s22 = ssub.s32 %s686_s15, %s943_s19 }
   0xf   : > { %p102_p7 = scmp.eq.s32.totalorder %s101_s22, 0  ;;  %s104_s23 = sadd.s32 1, %s670_s11 }
  0x10   : > { %s926_s21 = scalar_select %p762_p6, 1, 0 }
  0x11   : > { %s770_s24 = scalar_select %p102_p7, %s670_s11, %s104_s23  }
  0x12   : > { %p114_p8 = scmp.ne.s32.totalorder %s670_s11, %s666_s10  ;;  %p115_p9 = scmp.eq.s32.totalorder %s405_s17, 1 }
  0x13   : > { %p120_p10 = scmp.ne.s32.totalorder %s666_s10, %s662_s9  ;;  %p121_p11 = scmp.eq.s32.totalorder %s406_s18, 1 }
  0x14   : > { %p776_p12 = por %p115_p9, %p114_p8  ;;  %p443_p1 = scmp.lt.s32.totalorder %s690_s16, 2 }
  0x15   : > { %p781_p0 = por %p121_p11, %p120_p10  ;;  %s692_s27 = smov [#allocation3]  }
  0x16   : > { %s927_s25 = scalar_select %p776_p12, 1, 0 }
  0x17   : > { %s928_s26 = scalar_select %p781_p0, 1, 0 }
  0x18   : > { %s155_s28 = sshll.u32 %s692_s27, 4  ;;  %p788_p2 = pnand %p443_p1, %p758_p4  ;;  %s156_s28 = int_to_ptr.vmem [resolvable:$true] %s155_s28 }
  0x19   : > { %s523_s4 = scalar_lea.hbm %s920_s0, 256 }
  0x1a   : > { %p524_p3 = scmp.ne.s32.totalorder %s920_s0, %s523_s4  ;;  %p525_p5 = pneg %p788_p2 }
  0x1b   : > { %p530_p8 = scmp.lt.u32.totalorder %s523_s4, %s523_s4  ;;  %p532_p9 = scmp.lt.u32.totalorder %s523_s4, %s920_s0 }
  0x1c   : > { %p526_p7 = pnand %p525_p5, %p524_p3 }
  0x1d   : > { %p533_p10 = por %p532_p9, %p530_p8 }
  0x1e   : > { %p527_p4 = pneg %p526_p7 }
  0x20   : > { %p534_p11 = pnand %p533_p10, %p527_p4 }
  0x22   : > { %537 = shalt.err (!%p534_p11)
}
  0x23   : > { %s538_s12 = scalar_lea.vmem %s156_s28, 256  ;;  %s545_s17 = scalar_lea.vmem %s156_s28, 512 }
  0x24   : > { %p539_p1 = scmp.ne.s32.totalorder %s156_s28, %s538_s12  ;;  %p546_p12 = scmp.lt.s32.totalorder %s156_s28, %s156_s28 }
  0x25   : > { %p547_p6 = scmp.lt.s32.totalorder %s545_s17, %s538_s12 }
  0x26   : > { %p541_p13 = pnand %p539_p1, %p525_p5 }
  0x27   : > { %p548_p3 = por %p547_p6, %p546_p12 }
  0x28   : > { %p542_p0 = pneg %p541_p13 }
  0x2a   : > { %p549_p7 = pnand %p548_p3, %p542_p0 }
  0x2c   : > { %552 = shalt.err (!%p549_p7)
}
  0x2d   : > { %s693_s18 = smov 128   ;;  %s694_s20 = smov 8  }
  0x2e   : > { %435 = dma.hbm_to_vmem [thread:$0]  (!%p788_p2), %s920_s0, 256, %s156_s28, [#allocation4], %s693_s18, %s693_s18, %s694_s20  }
  0x2f   : > { %p415_p13 = scmp.ge.s32.totalorder %s690_s16, 1  ;;  %p187_p4 = scmp.lt.s32.totalorder %s690_s16, 3 }
  0x30   : > { %s695_s30 = smov [#allocation6]   ;;  %s553_s6 = scalar_lea.hbm %s921_s1, 256 }
  0x31   : > { %p819_p8 = pnand %p415_p13, %p187_p4  ;;  %s179_s3 = sshll.u32 %s695_s30, 4  ;;  %s180_s3 = int_to_ptr.vmem [resolvable:$true] %s179_s3 }
  0x32   : > { %p554_p6 = scmp.ne.s32.totalorder %s921_s1, %s553_s6  ;;  %p560_p9 = scmp.lt.u32.totalorder %s553_s6, %s553_s6 }
  0x33   : > { %s930_s27 = scalar_select %p819_p8, 1, 0 }
  0x34   : > { %p556_p12 = pnand %p554_p6, %p525_p5  ;;  %p562_p10 = scmp.lt.u32.totalorder %s553_s6, %s921_s1 }
  0x36   : > { %p557_p0 = pneg %p556_p12  ;;  %p563_p11 = por %p562_p10, %p560_p9 }
  0x38   : > { %p564_p1 = pnand %p563_p11, %p557_p0 }
  0x3a   : > { %567 = shalt.err (!%p564_p1)
}
  0x3b   : > { %s568_s17 = scalar_lea.vmem %s180_s3, 256  ;;  %s575_s22 = scalar_lea.vmem %s180_s3, 512 }
  0x3c   : > { %p569_p3 = scmp.ne.s32.totalorder %s180_s3, %s568_s17  ;;  %p576_p4 = scmp.lt.s32.totalorder %s180_s3, %s180_s3 }
  0x3d   : > { %p577_p8 = scmp.lt.s32.totalorder %s575_s22, %s568_s17 }
  0x3e   : > { %p571_p7 = pnand %p569_p3, %p525_p5 }
  0x3f   : > { %p578_p6 = por %p577_p8, %p576_p4 }
  0x40   : > { %p572_p13 = pneg %p571_p7 }
  0x42   : > { %p579_p12 = pnand %p578_p6, %p572_p13 }
  0x44   : > { %582 = shalt.err (!%p579_p12)
}
  0x45   : > { %438 = dma.hbm_to_vmem [thread:$0]  (!%p788_p2), %s921_s1, 256, %s180_s3, [#allocation7], %s693_s18, %s693_s18, %s694_s20  }
  0x46   : > { %p931_p0 = scmp.ne.s32.totalorder %s930_s27, 0 }
  0x47   : > { %s193_s4 = sand.u32 (!%p931_p0), 1, %s678_s13   ;;  %p932_p5 = scmp.ne.s32.totalorder (!%p931_p0), %s926_s21, 0 }
  0x48   : > { %191 = sbr.rel (%p931_p0) target bundleno = 123 (0x7b), region = 28  ;;  %s416_s5 = sshll.u32 (!%p931_p0), %s193_s4, 4 }
  0x49   : > { %s194_s6 = scalar_lea.sflag (!%p931_p0), [#allocation4], %s193_s4  ;;  %s197_s7 = scalar_lea.vmem (!%p931_p0), [#allocation3], %s416_s5 }
  0x4f   : > { %648 = dma.done.wait (%p932_p5), %s194_s6, 256  }
  0x50   : > { %650 = vsyncadd (%p932_p5), %s194_s6, 4294967040  ;;  %s203_s29 = scalar_lea.sflag [#allocation7], %s193_s4  ;;  %s206_s8 = scalar_lea.vmem [#allocation6], %s416_s5 }
  0x51   : > { %652 = dma.done.wait (%p932_p5), %s203_s29, 256  }
  0x52   : > { %654 = vsyncadd (%p932_p5), %s203_s29, 4294967040  ;;  %v245_v0 = vld [vmem:[%s197_s7] sm:$0xff]  ;;  %v246_v1 = vld [vmem:[%s197_s7 + $0x8] sm:$0xff]  ;;  %v271_v8 = vlaneseq  ;;  %s419_s18 = sshll.u32 %s682_s14, 4  ;;  %s229_s21 = sand.u32 1, %s666_s10  }
  0x53   : > { %v247_v2 = vld [vmem:[%s206_s8] sm:$0xff]  ;;  %v248_v3 = vld [vmem:[%s206_s8 + $0x8] sm:$0xff]  ;;  %v274_v13 = vstv %s419_s18  ;;  %s418_s20 = sshll.u32 %s229_s21, 3  ;;  %s421_s28 = sshll.u32 %s682_s14, 7 }
  0x54   : > { %v249_v4 = vsub.f32 %v245_v0, %v247_v2  ;;  %v250_v5 = vsub.f32 %v246_v1, %v248_v3  ;;  %v272_v11 = vshrl.u32 %v271_v8, 7  ;;  %s231_s27 = scalar_lea.vmem [#allocation8], %s418_s20  ;;  %s867_s22 = scalar_lea.hbm %s922_s2, %s421_s28 }
  0x55   : > { %s304_s3 = sshll.u32 %s231_s27, 4  ;;  %s291_s23 = scalar_lea.sflag [#allocation5], %s229_s21  ;;  %s862_s3 = int_to_ptr.vmem [resolvable:$true] %s304_s3 }
  0x56   : > { %v251_v6 = vmul.f32 %v249_v4, %v249_v4  ;;  %v252_v7 = vmul.f32 %v250_v5, %v250_v5  ;;  %v273_v12 = vadd.s32 8, %v272_v11  ;;  %v275_v14 = vadd.s32 %v274_v13, %v272_v11  ;;  %s583_s30 = scalar_lea.vmem %s862_s3, 128  ;;  %p933_p8 = scmp.ne.s32.totalorder %s927_s25, 0 }
  0x57   : > { %p584_p2 = scmp.ne.s32.totalorder %s862_s3, %s583_s30  ;;  %s696_s14 = smov [#allocation8]  }
  0x58   : > { %v253_v9 = vadd.f32 1e-06, %v251_v6  ;;  %v254_v10 = vadd.f32 1e-06, %v252_v7  ;;  %v276_v15 = vadd.s32 %v274_v13, %v273_v12  ;;  %vm277_vm4 = vcmp.lt.s32.totalorder %v275_v14, 16  ;;  %s587_s4 = sshll.u32 %s696_s14, 4  ;;  %s588_s4 = int_to_ptr.vmem [resolvable:$false] %s587_s4 }
  0x59   : > { %p585_p9 = pnand %p584_p2, %p933_p8  ;;  %s589_s5 = scalar_lea.vmem %s588_s4, 256 }
  0x5a   : > { %519 = vrsqrt.f32 %v253_v9  ;;  %vm257_vm0 = vcmp.eq.f32.partialorder %v253_v9, inf  ;;  %v260_v17 = vand.u32 2147483648, %v253_v9  ;;  %vm259_vm1 = vcmp.eq.f32.partialorder %v253_v9, 0.0  ;;  %p590_p11 = scmp.lt.s32.totalorder %s862_s3, %s588_s4  ;;  %p591_p1 = scmp.lt.s32.totalorder %s589_s5, %s583_s30 }
  0x5b   : > { %521 = vrsqrt.f32 %v254_v10  ;;  %vm264_vm2 = vcmp.eq.f32.partialorder %v254_v10, inf  ;;  %v267_v20 = vand.u32 2147483648, %v254_v10  ;;  %vm266_vm3 = vcmp.eq.f32.partialorder %v254_v10, 0.0  ;;  %p586_p10 = pneg %p585_p9 }
  0x5c   : > { %vm278_vm5 = vcmp.lt.s32.totalorder %v276_v15, 16  ;;  %p592_p3 = por %p591_p1, %p590_p11 }
  0x5e   : > { %p593_p7 = pnand %p592_p3, %p586_p10 }
  0x64   : > { %v520_v16 = vpop.eup %519 }
  0x65   : > { %v522_v18 = vpop.eup %521  ;;  %v256_v19 = vmul.f32 %v520_v16, %v253_v9 }
  0x66   : > { %v263_v21 = vmul.f32 %v522_v18, %v254_v10 }
  0x67   : > { %v258_v22 = vsel %vm257_vm0, %v253_v9, %v256_v19 }
  0x68   : > { %v261_v23 = vsel %vm259_vm1, %v260_v17, %v258_v22  ;;  %v265_v24 = vsel %vm264_vm2, %v254_v10, %v263_v21 }
  0x69   : > { %v268_v25 = vsel %vm266_vm3, %v267_v20, %v265_v24  ;;  %v279_v26 = vsel %vm277_vm4, %v261_v23, 0.0 }
  0x6a   : > { %v280_v27 = vsel %vm278_vm5, %v268_v25, 0.0 }
  0x6b   : > { %v282_v28 = vadd.f32 %v280_v27, %v279_v26 }
  0x6d   : > { %289 = vst [vmem:[%s231_s27] sm:$0xff] %v282_v28 }
  0x6e   : > { %596 = shalt.err (!%p593_p7)
}
  0x6f   : > { %s597_s6 = scalar_lea.hbm %s867_s22, 128  ;;  %s601_s8 = scalar_lea.hbm %s922_s2, 256 }
  0x70   : > { %p598_p13 = scmp.ne.s32.totalorder %s867_s22, %s597_s6  ;;  %p602_p12 = scmp.lt.u32.totalorder %s867_s22, %s922_s2 }
  0x71   : > { %p603_p0 = scmp.lt.u32.totalorder %s601_s8, %s597_s6  ;;  %p605_p2 = scmp.lt.u32.totalorder %s597_s6, %s867_s22 }
  0x72   : > { %p599_p4 = pnand %p598_p13, %p933_p8 }
  0x73   : > { %p604_p5 = por %p603_p0, %p602_p12 }
  0x74   : > { %p600_p6 = pneg %p599_p4 }
  0x75   : > { %p606_p9 = por %p605_p2, %p604_p5 }
  0x77   : > { %p607_p10 = pnand %p606_p9, %p600_p6 }
  0x79   : > { %610 = shalt.err (!%p607_p10)
}
  0x7a   : > { %430 = dma.vmem_to_hbm [thread:$0]  (%p933_p8), %s862_s3, 128, %s867_s22, %s291_s23  }
  0x7b PF: > { %s316_s20 = sand.u32 1, %s662_s9   ;;  %p934_p11 = scmp.ne.s32.totalorder %s928_s26, 0 }
  0x7c   : > { %p935_p1 = scmp.ge.s32.totalorder %s690_s16, 2  ;;  %s317_s27 = scalar_lea.sflag [#allocation5], %s316_s20 }
  0x7e   : > { %p440_p3 = pnand %p935_p1, %p934_p11 }
  0x80   : > { %656 = dma.done.wait (!%p440_p3), %s317_s27, 128  }
  0x81   : > { %658 = vsyncadd (!%p440_p3), %s317_s27, 4294967168  ;;  %s21_s16 = sadd.s32 1, %s690_s16   ;;  %s936_s9 = smov %s666_s10 }
  0x82   : > { %p18_p7 = scmp.ge.s32.totalorder %s21_s16, 4   ;;  %s937_s10 = smov %s670_s11 }
  0x83   : > { %s938_s11 = smov %s770_s24  ;;  %s939_s12 = smov %s678_s13 }
  0x84   : > { %s910_s13 = smov 0   ;;  %s940_s14 = smov %s686_s15 }
  0x85   : > { %s941_s15 = smov %s943_s19  ;;  %20 = sbr.rel (!%p18_p7) target bundleno = 9 (0x9), region = 94 }
  0x8c   :  { %322 = vsyncpa [#allocation4], 1 }
  0x8d   :  { %324 = vsyncpa [#allocation4 + $0x1], 1 }
  0x8e   :  { %325 = vsyncpa [#allocation7], 1 }
  0x8f   :  { %327 = vsyncpa [#allocation7 + $0x1], 1 }
  0x90   :  { %328 = vsyncpa [#allocation5], 1 }
  0x91   :  { %330 = vsyncpa [#allocation5 + $0x1], 1 }

</bundles_post_ra>
